<compile_context>
chip_gen: v7x
topology: tpu7x:2x2x1
jax: 0.10.0
libtpu: 0.0.40
codegen_flags: <defaults>
</compile_context>

<pallas_src>
import functools
import math

import jax
import jax.numpy as jnp
from jax import lax
from jax.experimental import pallas as pl
from jax.experimental.pallas import tpu as pltpu

_MAXNORM = 1e-5          # torch.renorm maxnorm
_RENORM_EPS = 1e-7       # torch.renorm internal eps
_NORMALIZE_EPS = 1e-12   # F.normalize eps
_VMEM_LIMIT = 64 * 1024 * 1024  # fits v7x's 64 MiB physical VMEM; ample on v5e/v6e


# --------------------------------------------------------------------------- #
# Prepass: column renorm factor  (1, C)  — hoisted out of the batch loop.
# --------------------------------------------------------------------------- #
def _renorm_factor_kernel(w_ref, f_ref):
    w = w_ref[...].astype(jnp.float32)                                # (F, tC)
    col_norm = jnp.sqrt(jnp.sum(w * w, axis=0, keepdims=True))        # (1, tC)
    rescale = jnp.where(col_norm > _MAXNORM,
                        _MAXNORM / (col_norm + _RENORM_EPS),
                        1.0)
    f_ref[...] = rescale * 1e5


def _renorm_factor(weight, block_c):
    F, C = weight.shape
    return pl.pallas_call(
        _renorm_factor_kernel,
        out_shape=jax.ShapeDtypeStruct((1, C), jnp.float32),
        grid_spec=pltpu.PrefetchScalarGridSpec(
            num_scalar_prefetch=0,
            grid=(C // block_c,),
            in_specs=[pl.BlockSpec((F, block_c), lambda c: (0, c))],
            out_specs=pl.BlockSpec((1, block_c), lambda c: (0, c)),
        ),
        compiler_params=pltpu.CompilerParams(
            dimension_semantics=("parallel",),
            vmem_limit_bytes=_VMEM_LIMIT),
    )(weight)


def _normalize_rows(x_ref, matmul_dtype):
    """Row L2 normalize the current x tile (F.normalize semantics)."""
    x = x_ref[...].astype(jnp.float32)                                # (tB, F)
    sumsq = jnp.sum(x * x, axis=1, keepdims=True)                     # (tB, 1)
    xn = x * lax.rsqrt(jnp.maximum(sumsq, _NORMALIZE_EPS * _NORMALIZE_EPS))
    return xn.astype(matmul_dtype)


# --------------------------------------------------------------------------- #
# Training kernel: online-softmax cross entropy, per-row loss output only.
# --------------------------------------------------------------------------- #
def _train_kernel(x_ref, w_ref, f_ref, lbl_ref, loss_ref,
                  xn_sc, m_sc, l_sc, t_sc, *, s, block_c, matmul_dtype):
    c = pl.program_id(1)

    @pl.when(c == 0)
    def _init():
        xn_sc[...] = _normalize_rows(x_ref, matmul_dtype)
        m_sc[...] = jnp.full(m_sc.shape, -jnp.inf, m_sc.dtype)
        l_sc[...] = jnp.zeros(l_sc.shape, l_sc.dtype)
        t_sc[...] = jnp.zeros(t_sc.shape, t_sc.dtype)

    # Raw weight tile to the MXU; fold the per-column renorm scale in after the
    # matmul (mathematically identical, far fewer VPU multiplies).
    w_mm = w_ref[...].astype(matmul_dtype)                             # (F, tC)
    cos = jnp.dot(xn_sc[...], w_mm,
                  preferred_element_type=jnp.float32) * f_ref[...]     # (tB, tC)
    logits = s * jnp.clip(cos, -1.0, 1.0)

    # Target-logit pick: each label falls in exactly one C tile.
    local_lbl = lbl_ref[...] - c * block_c                             # (tB, 1)
    cls = lax.broadcasted_iota(jnp.int32, logits.shape, 1)             # (tB, tC)
    t_sc[...] += jnp.sum(jnp.where(cls == local_lbl, logits, 0.0),
                         axis=1, keepdims=True)

    # Online logsumexp across C tiles.
    m_prev = m_sc[...]
    m_new = jnp.maximum(m_prev, jnp.max(logits, axis=1, keepdims=True))
    l_sc[...] = (l_sc[...] * jnp.exp(m_prev - m_new)
                 + jnp.sum(jnp.exp(logits - m_new), axis=1, keepdims=True))
    m_sc[...] = m_new

    @pl.when(c == pl.num_programs(1) - 1)
    def _finalize():
        # per-row CE = logsumexp(logits) - logits[label]
        loss_ref[...] = (m_sc[...] + jnp.log(l_sc[...])) - t_sc[...]


# --------------------------------------------------------------------------- #
# Eval kernel: logits only (no exp / logsumexp work); x_n cached per B tile.
# --------------------------------------------------------------------------- #
def _eval_kernel(x_ref, w_ref, f_ref, out_ref, xn_sc, *, s, matmul_dtype):
    @pl.when(pl.program_id(1) == 0)
    def _init():
        xn_sc[...] = _normalize_rows(x_ref, matmul_dtype)

    w_mm = w_ref[...].astype(matmul_dtype)
    cos = jnp.dot(xn_sc[...], w_mm,
                  preferred_element_type=jnp.float32) * f_ref[...]
    out_ref[...] = (s * jnp.clip(cos, -1.0, 1.0)).astype(out_ref.dtype)


# --------------------------------------------------------------------------- #
# Wrapper
# --------------------------------------------------------------------------- #
def _pick_block(dim, candidates):
    for c in candidates:
        if c <= dim and dim % c == 0:
            return c
    return dim  # full extent (always a legal block)


def norm_softmax_forward(x, weight, labels=None, *, s=30.0, training=True,
                         block_b=None, block_c=None,
                         matmul_dtype=jnp.float32):
    """Pallas implementation of Norm_Softmax.forward.

    matmul_dtype=jnp.bfloat16 feeds the MXU bf16 operands (recommended on
    v6e/v7x for throughput); float32 keeps exact numerical parity with the
    PyTorch reference.
    """
    B, F = x.shape
    F2, C = weight.shape
    assert F == F2

    if block_b is None:
        block_b = _pick_block(B, (256, 128, 64, 32, 16, 8))
    if block_c is None:
        # Keep the double-buffered weight tile (~2 x F * tC * itemsize) well
        # under the scoped-VMEM budget of every generation (worst case v7x).
        itemsize = jnp.dtype(weight.dtype).itemsize
        max_c = max(128, ((6 * 1024 * 1024) // (F * itemsize)) // 128 * 128)
        cands = tuple(c for c in (8192, 4096, 2048, 1024, 512, 256, 128)
                      if c <= max_c)
        block_c = _pick_block(C, cands)

    # Hoisted column-renorm factor (computed once, reused by every batch tile).
    factor = _renorm_factor(weight, block_c)

    grid = (B // block_b, C // block_c)
    x_spec = pl.BlockSpec((block_b, F), lambda b, c: (b, 0))
    w_spec = pl.BlockSpec((F, block_c), lambda b, c: (0, c))
    f_spec = pl.BlockSpec((1, block_c), lambda b, c: (0, c))

    if training:
        assert labels is not None
        labels2d = labels.astype(jnp.int32).reshape(B, 1)
        kernel = functools.partial(_train_kernel, s=float(s),
                                   block_c=block_c, matmul_dtype=matmul_dtype)
        row_loss = pl.pallas_call(
            kernel,
            out_shape=jax.ShapeDtypeStruct((B, 1), jnp.float32),
            grid_spec=pltpu.PrefetchScalarGridSpec(
                num_scalar_prefetch=0,
                grid=grid,
                in_specs=[x_spec, w_spec, f_spec,
                          pl.BlockSpec((block_b, 1), lambda b, c: (b, 0))],
                out_specs=pl.BlockSpec((block_b, 1), lambda b, c: (b, 0)),
                scratch_shapes=[
                    pltpu.VMEM((block_b, F), matmul_dtype),   # cached x_n
                    pltpu.VMEM((block_b, 1), jnp.float32),    # running max
                    pltpu.VMEM((block_b, 1), jnp.float32),    # running exp-sum
                    pltpu.VMEM((block_b, 1), jnp.float32),    # target logit
                ]),
            compiler_params=pltpu.CompilerParams(
                dimension_semantics=("parallel", "arbitrary"),
                vmem_limit_bytes=_VMEM_LIMIT),
        )(x, weight, factor, labels2d)
        # Final mean over B rows: trivially cheap JAX reduction.
        return jnp.mean(row_loss)

    kernel = functools.partial(_eval_kernel, s=float(s),
                               matmul_dtype=matmul_dtype)
    logits = pl.pallas_call(
        kernel,
        out_shape=jax.ShapeDtypeStruct((B, C), jnp.float32),
        grid_spec=pltpu.PrefetchScalarGridSpec(
            num_scalar_prefetch=0,
            grid=grid,
            in_specs=[x_spec, w_spec, f_spec],
            out_specs=pl.BlockSpec((block_b, block_c), lambda b, c: (b, c)),
            scratch_shapes=[pltpu.VMEM((block_b, F), matmul_dtype)],  # cached x_n
        ),
        compiler_params=pltpu.CompilerParams(
            dimension_semantics=("parallel", "arbitrary"),
            vmem_limit_bytes=_VMEM_LIMIT),
    )(x, weight, factor)
    return logits


def init_norm_softmax_weight(key, in_features, num_classes):
    """kaiming_uniform_(a=sqrt(1)) on an (in_features, num_classes) tensor."""
    fan_in = num_classes  # PyTorch fan_in = tensor.size(1)
    bound = math.sqrt(3.0) / math.sqrt(fan_in)
    return jax.random.uniform(
        key, (in_features, num_classes), jnp.float32, minval=-bound, maxval=bound
    )


def _reference(x, weight, labels, s):
    """Pure-JAX reference matching the PyTorch module."""
    w = weight.astype(jnp.float32)
    col_norm = jnp.sqrt(jnp.sum(w * w, axis=0, keepdims=True))
    ww = w * jnp.where(col_norm > _MAXNORM,
                       _MAXNORM / (col_norm + _RENORM_EPS), 1.0) * 1e5
    xf = x.astype(jnp.float32)
    xn = xf / jnp.maximum(jnp.sqrt(jnp.sum(xf * xf, axis=1, keepdims=True)),
                          _NORMALIZE_EPS)
    logits = s * jnp.clip(xn @ ww, -1.0, 1.0)
    lse = jax.scipy.special.logsumexp(logits, axis=1)
    tgt = jnp.take_along_axis(logits, labels[:, None].astype(jnp.int32), axis=1)[:, 0]
    return logits, jnp.mean(lse - tgt)


if __name__ == "__main__":
    key = jax.random.PRNGKey(0)
    k_w, k_x, k_l = jax.random.split(key, 3)

    batch, in_features, num_classes = 16, 128, 256
    s = 30.0

    weight = init_norm_softmax_weight(k_w, in_features, num_classes)
    x = jax.random.normal(k_x, (batch, in_features), jnp.float32)
    labels = jax.random.randint(k_l, (batch,), 0, num_classes, jnp.int32)

    # Force a multi-tile grid (2 batch tiles x 2 class tiles) on the tiny demo
    # shapes so the online-softmax / weight-streaming path is exercised.
    loss = norm_softmax_forward(x, weight, labels, s=s, training=True,
                                block_b=8, block_c=128)
    logits = norm_softmax_forward(x, weight, labels, s=s, training=False,
                                  block_b=8, block_c=128)
    loss, logits = jax.block_until_ready((loss, logits))

    ref_logits, ref_loss = _reference(x, weight, labels, s)

    assert loss.shape == () and bool(jnp.isfinite(loss))
    assert logits.shape == (batch, num_classes)
    assert bool(jnp.all(jnp.abs(logits) <= s + 1e-3))
    assert bool(jnp.allclose(logits, ref_logits, atol=1e-1, rtol=1e-2))
    assert bool(jnp.allclose(loss, ref_loss, atol=5e-2, rtol=1e-2))

    # bf16 MXU operands (recommended on v6e/v7x) — sanity run only.
    loss_bf16 = norm_softmax_forward(x, weight, labels, s=s, training=True,
                                     block_b=8, block_c=128,
                                     matmul_dtype=jnp.bfloat16)
    loss_bf16 = jax.block_until_ready(loss_bf16)
    assert bool(jnp.isfinite(loss_bf16))
    assert bool(jnp.abs(loss_bf16 - ref_loss) < 0.5)

    print("KERNEL_OK")
</pallas_src>

<mosaic_0001>
module attributes {stable_mosaic.version = 11 : i64} {
  func.func @_renorm_factor_kernel(%arg0: i32, %arg1: memref<128x128xf32, #tpu.memory_space<vmem>>, %arg2: memref<1x128xf32, #tpu.memory_space<vmem>>) attributes {dimension_semantics = [#tpu.dimension_semantics<parallel>], iteration_bounds = array<i64: 2>, scalar_prefetch = 0 : i64, scratch_operands = 0 : i64, tpu.core_type = #tpu.core_type<tc>, window_params = [{transform_indices = @transform_0, window_bounds = array<i64: 128, 128>}, {transform_indices = @transform_1, window_bounds = array<i64: 1, 128>}]} {
    %c0 = arith.constant 0 : index
    %c0_0 = arith.constant 0 : index
    %0 = vector.load %arg1[%c0, %c0_0] : memref<128x128xf32, #tpu.memory_space<vmem>>, vector<128x128xf32>
    %1 = arith.mulf %0, %0 : vector<128x128xf32>
    %cst = arith.constant dense<0.000000e+00> : vector<128xf32>
    %2 = vector.multi_reduction <add>, %1, %cst [0] : vector<128x128xf32> to vector<128xf32>
    %3 = vector.shape_cast %2 : vector<128xf32> to vector<1x128xf32>
    %4 = math.sqrt %3 : vector<1x128xf32>
    %cst_1 = arith.constant 9.99999974E-6 : f32
    %5 = vector.broadcast %cst_1 : f32 to vector<1x128xf32>
    %6 = arith.cmpf ogt, %4, %5 : vector<1x128xf32>
    %cst_2 = arith.constant 1.000000e-07 : f32
    %7 = vector.broadcast %cst_2 : f32 to vector<1x128xf32>
    %8 = arith.addf %4, %7 : vector<1x128xf32>
    %cst_3 = arith.constant 9.99999974E-6 : f32
    %9 = vector.broadcast %cst_3 : f32 to vector<1x128xf32>
    %10 = arith.divf %9, %8 : vector<1x128xf32>
    %cst_4 = arith.constant 1.000000e+00 : f32
    %11 = vector.broadcast %cst_4 : f32 to vector<1x128xf32>
    %12 = arith.select %6, %10, %11 : vector<1x128xi1>, vector<1x128xf32>
    %cst_5 = arith.constant 1.000000e+05 : f32
    %13 = vector.broadcast %cst_5 : f32 to vector<1x128xf32>
    %14 = arith.mulf %12, %13 : vector<1x128xf32>
    %c0_6 = arith.constant 0 : index
    %c0_7 = arith.constant 0 : index
    %15 = vector.load %arg2[%c0_6, %c0_7] : memref<1x128xf32, #tpu.memory_space<vmem>>, vector<1x128xf32>
    tpu.vector_store %arg2[%c0_6, %c0_7], %14 {strides = array<i32>} : memref<1x128xf32, #tpu.memory_space<vmem>>, vector<1x128xf32>,
    return
  }
  func.func @transform_0(%arg0: i32) -> (i32, i32) {
    %c0_i32 = arith.constant 0 : i32
    %c0_i32_0 = arith.constant 0 : i32
    return %c0_i32, %arg0 : i32, i32
  }
  func.func @transform_1(%arg0: i32) -> (i32, i32) {
    %c0_i32 = arith.constant 0 : i32
    %c0_i32_0 = arith.constant 0 : i32
    return %c0_i32, %arg0 : i32, i32
  }
}

</mosaic_0001>

<bundles_post_ra>
// kernel: tpu_custom_call.1
= control target key start
LH: loop header
LB: loop body
LE: loop exit
PB: predicated region body
PF: predicated region fallthrough
CT: control target
= control target key end

     0   :  { %6 = vsyncpa [#allocation3], 0  ;;  %s636_s0 = inlined_call_operand.hbm [shape: f32[128,256], index: 0, kind: input, shape index: {}]   ;;  %s637_s1 = inlined_call_operand.hbm [shape: f32[1,256], index: 1, kind: output, shape index: {}]  }
   0x1   :  { %8 = vsyncpa [#allocation3 + $0x1], 0 }
   0x2   :  { %9 = vsyncpa [#allocation4], 0 }
   0x3   :  { %11 = vsyncpa [#allocation4 + $0x1], 0  ;;  %s455_s6 = smov 0   ;;  %s457_s7 = smov 0  }
   0x4   :  { %s459_s8 = smov 0   ;;  %s461_s9 = smov 0  }
   0x5 LB: > { %s476_s10 = sadd.s32 4294967295, %s438_s9   ;;  %s279_s11 = sadd.s32 4294967294, %s438_s9   ;;  %s438_s9 = sphi %s461_s9, %s651_s9   ;;  %s434_s8 = sphi %s459_s8, %s650_s8   ;;  %s430_s7 = sphi %s457_s7, %s649_s7   ;;  %s426_s6 = sphi %s455_s6, %s648_s6  }
   0x6   : > { %s480_s12 = sadd.s32 1, %s438_s9   ;;  %s24_s13 = sadd.s32 1, %s434_s8 }
   0x7   : > { %s21_s14 = ssub.s32 %s438_s9, %s480_s12  ;;  %p31_p0 = scmp.ne.s32.totalorder %s434_s8, %s430_s7 }
   0x8   : > { %p22_p1 = scmp.eq.s32.totalorder %s21_s14, 0  ;;  %p32_p2 = scmp.eq.s32.totalorder %s438_s9, 0 }
   0x9   : > { %p37_p3 = scmp.ne.s32.totalorder %s430_s7, %s426_s6  ;;  %p38_p4 = scmp.eq.s32.totalorder %s476_s10, 0 }
   0xa   : > { %s492_s15 = scalar_select %p22_p1, %s434_s8, %s24_s13  }
   0xb   : > { %p494_p5 = por %p32_p2, %p31_p0  ;;  %p498_p6 = por %p38_p4, %p37_p3 }
   0xc   : > { %p61_p7 = scmp.eq.s32.totalorder %s476_s10, 1  ;;  %p67_p8 = scmp.eq.s32.totalorder %s279_s11, 1 }
   0xd   : > { %p301_p10 = scmp.lt.s32.totalorder %s438_s9, 2  ;;  %s87_s20 = sand.u32 1, %s434_s8  }
   0xe   : > { %p505_p11 = por %p61_p7, %p31_p0  ;;  %p509_p12 = por %p67_p8, %p37_p3 }
   0xf   : > { %s283_s21 = sshll.u32 %s438_s9, 7  ;;  %s282_s22 = sshll.u32 %s87_s20, 7 }
  0x10   : > { %s641_s18 = scalar_select %p505_p11, 1, 0 }
  0x11   : > { %s642_s19 = scalar_select %p509_p12, 1, 0 }
  0x12   : > { %s518_s25 = scalar_lea.hbm %s636_s0, %s283_s21  ;;  %s91_s26 = scalar_lea.vmem [#allocation2], %s282_s22 }
  0x13   : > { %s97_s27 = sshll.u32 %s91_s26, 4  ;;  %p522_p13 = pnand %p301_p10, %p494_p5  ;;  %s526_s27 = int_to_ptr.vmem [resolvable:$true] %s97_s27 }
  0x14   : > { %s529_s29 = scalar_lea.sflag [#allocation3], %s87_s20  ;;  %s342_s30 = scalar_lea.hbm %s518_s25, 2048 }
  0x15   : > { %p343_p1 = scmp.ne.s32.totalorder %s518_s25, %s342_s30  ;;  %p344_p2 = pneg %p522_p13 }
  0x16   : > { %s347_s4 = scalar_lea.hbm %s636_s0, 4096  ;;  %p348_p5 = scmp.lt.u32.totalorder %s518_s25, %s636_s0 }
  0x17   : > { %p345_p3 = pnand %p344_p2, %p343_p1  ;;  %p349_p7 = scmp.lt.u32.totalorder %s347_s4, %s342_s30 }
  0x18   : > { %p351_p10 = scmp.lt.u32.totalorder %s342_s30, %s518_s25 }
  0x19   : > { %p346_p4 = pneg %p345_p3  ;;  %p350_p8 = por %p349_p7, %p348_p5 }
  0x1b   : > { %p352_p9 = por %p351_p10, %p350_p8 }
  0x1d   : > { %p353_p0 = pnand %p352_p9, %p346_p4 }
  0x1f   : > { %356 = shalt.err (!%p353_p0)
}
  0x20   : > { %s357_s13 = scalar_lea.vmem %s526_s27, 2048  ;;  %s440_s14 = smov [#allocation2]  }
  0x21   : > { %p358_p1 = scmp.ne.s32.totalorder %s526_s27, %s357_s13  ;;  %s362_s16 = sshll.u32 %s440_s14, 4  ;;  %s363_s16 = int_to_ptr.vmem [resolvable:$false] %s362_s16 }
  0x22   : > { %s364_s20 = scalar_lea.vmem %s363_s16, 4096  ;;  %p365_p11 = scmp.lt.s32.totalorder %s526_s27, %s363_s16 }
  0x23   : > { %p360_p3 = pnand %p358_p1, %p344_p2  ;;  %p366_p5 = scmp.lt.s32.totalorder %s364_s20, %s357_s13 }
  0x25   : > { %p361_p12 = pneg %p360_p3  ;;  %p367_p7 = por %p366_p5, %p365_p11 }
  0x27   : > { %p368_p8 = pnand %p367_p7, %p361_p12 }
  0x29   : > { %371 = shalt.err (!%p368_p8)
}
  0x2a   : > { %s441_s21 = smov 256   ;;  %s442_s22 = smov 128  }
  0x2b   : > { %s443_s23 = smov 8   ;;  %p105_p9 = scmp.lt.s32.totalorder %s438_s9, 3 }
  0x2c   : > { %296 = dma.hbm_to_vmem [thread:$0]  (!%p522_p13), %s518_s25, 2048, %s526_s27, %s529_s29, %s441_s21, %s442_s22, %s443_s23  }
  0x2d   : > { %p644_p0 = scmp.ge.s32.totalorder %s438_s9, 1 }
  0x2f   : > { %p106_p2 = pnand %p644_p0, %p105_p9 }
  0x30   : > { %s561_s24 = sand.u32 (!%p106_p2), 1, %s430_s7  }
  0x31   : > { %109 = sbr.rel (%p106_p2) target bundleno = 149 (0x95), region = 24  ;;  %s285_s26 = sshll.u32 (!%p106_p2), %s561_s24, 7 }
  0x32   : > { %s112_s30 = scalar_lea.sflag (!%p106_p2), [#allocation3], %s561_s24  ;;  %s565_s2 = scalar_lea.vmem (!%p106_p2), [#allocation2], %s285_s26 }
  0x38   : > { %417 = dma.done.wait (%p498_p6), %s112_s30, 2048  }
  0x39   : > { %419 = vsyncadd (%p498_p6), %s112_s30, 4294965248  ;;  %v133_v0 = vld [vmem:[%s565_s2] sm:$0xff]  ;;  %v134_v1 = vld [vmem:[%s565_s2 + $0x8] sm:$0xff]  ;;  %s132_s17 = scalar_lea.vmem [#allocation5], %s561_s24  ;;  %s286_s27 = sshll.u32 %s476_s10, 4 }
  0x3a   : > { %v135_v2 = vld [vmem:[%s565_s2 + $0x10] sm:$0xff]  ;;  %v136_v3 = vld [vmem:[%s565_s2 + $0x18] sm:$0xff]  ;;  %v149_v4 = vmul.f32 %v133_v0, %v133_v0  ;;  %v150_v5 = vmul.f32 %v134_v1, %v134_v1  ;;  %v137_v7 = vld [vmem:[%s565_s2 + $0x20] sm:$0xff]  ;;  %s213_s25 = sshll.u32 %s132_s17, 4  ;;  %s594_s3 = scalar_lea.hbm %s637_s1, %s286_s27  ;;  %s589_s25 = int_to_ptr.vmem [resolvable:$true] %s213_s25 }
  0x3b   : > { %v151_v6 = vmul.f32 %v135_v2, %v135_v2  ;;  %v152_v8 = vmul.f32 %v136_v3, %v136_v3  ;;  %v138_v10 = vld [vmem:[%s565_s2 + $0x28] sm:$0xff]  ;;  %v153_v11 = vmul.f32 %v137_v7, %v137_v7  ;;  %v139_v13 = vld [vmem:[%s565_s2 + $0x30] sm:$0xff]  ;;  %v140_v16 = vld [vmem:[%s565_s2 + $0x38] sm:$0xff]  ;;  %s201_s4 = scalar_lea.sflag [#allocation4], %s561_s24  ;;  %s372_s5 = scalar_lea.vmem %s589_s25, 16 }
  0x3c   : > { %v165_v9 = vadd.f32 %v150_v5, %v149_v4  ;;  %v154_v14 = vmul.f32 %v138_v10, %v138_v10  ;;  %v155_v17 = vmul.f32 %v139_v13, %v139_v13  ;;  %v141_v19 = vld [vmem:[%s565_s2 + $0x40] sm:$0xff]  ;;  %v156_v20 = vmul.f32 %v140_v16, %v140_v16  ;;  %v142_v22 = vld [vmem:[%s565_s2 + $0x48] sm:$0xff]  ;;  %v143_v25 = vld [vmem:[%s565_s2 + $0x50] sm:$0xff]  ;;  %p373_p6 = scmp.ne.s32.totalorder %s589_s25, %s372_s5  ;;  %p645_p11 = scmp.ne.s32.totalorder %s641_s18, 0 }
  0x3d   : > { %v157_v23 = vmul.f32 %v141_v19, %v141_v19  ;;  %v158_v26 = vmul.f32 %v142_v22, %v142_v22  ;;  %v144_v28 = vld [vmem:[%s565_s2 + $0x58] sm:$0xff]  ;;  %v159_v29 = vmul.f32 %v143_v25, %v143_v25  ;;  %v145_v31 = vld [vmem:[%s565_s2 + $0x60] sm:$0xff]  ;;  %v146_v34 = vld [vmem:[%s565_s2 + $0x68] sm:$0xff]  ;;  %s444_s10 = smov [#allocation5]  }
  0x3e   : > { %v166_v12 = vadd.f32 %v165_v9, %v151_v6  ;;  %v160_v32 = vmul.f32 %v144_v28, %v144_v28  ;;  %v161_v35 = vmul.f32 %v145_v31, %v145_v31  ;;  %v147_v37 = vld [vmem:[%s565_s2 + $0x70] sm:$0xff]  ;;  %v162_v38 = vmul.f32 %v146_v34, %v146_v34  ;;  %v148_v40 = vld [vmem:[%s565_s2 + $0x78] sm:$0xff]  ;;  %p374_p12 = pnand %p373_p6, %p645_p11  ;;  %s376_s11 = sshll.u32 %s444_s10, 4  ;;  %s377_s11 = int_to_ptr.vmem [resolvable:$false] %s376_s11 }
  0x3f   : > { %v163_v41 = vmul.f32 %v147_v37, %v147_v37  ;;  %v164_v43 = vmul.f32 %v148_v40, %v148_v40  ;;  %s378_s13 = scalar_lea.vmem %s377_s11, 32  ;;  %p379_p4 = scmp.lt.s32.totalorder %s589_s25, %s377_s11 }
  0x40   : > { %v167_v15 = vadd.f32 %v166_v12, %v152_v8  ;;  %p375_p13 = pneg %p374_p12  ;;  %p380_p10 = scmp.lt.s32.totalorder %s378_s13, %s372_s5 }
  0x42   : > { %v168_v18 = vadd.f32 %v167_v15, %v153_v11  ;;  %p381_p1 = por %p380_p10, %p379_p4 }
  0x44   : > { %v169_v21 = vadd.f32 %v168_v18, %v154_v14  ;;  %p382_p3 = pnand %p381_p1, %p375_p13 }
  0x46   : > { %v170_v24 = vadd.f32 %v169_v21, %v155_v17 }
  0x48   : > { %v171_v27 = vadd.f32 %v170_v24, %v156_v20 }
  0x4a   : > { %v172_v30 = vadd.f32 %v171_v27, %v157_v23 }
  0x4c   : > { %v173_v33 = vadd.f32 %v172_v30, %v158_v26 }
  0x4e   : > { %v174_v36 = vadd.f32 %v173_v33, %v159_v29 }
  0x50   : > { %v175_v39 = vadd.f32 %v174_v36, %v160_v32 }
  0x52   : > { %v176_v42 = vadd.f32 %v175_v39, %v161_v35 }
  0x54   : > { %v177_v44 = vadd.f32 %v176_v42, %v162_v38 }
  0x56   : > { %v178_v45 = vadd.f32 %v177_v44, %v163_v41 }
  0x58   : > { %v179_v46 = vadd.f32 %v178_v45, %v164_v43 }
  0x5a   : > { %v180_v47 = vrot.slane %v179_v46, 4 }
  0x5c   : > { %v181_v48 = vadd.f32 %v180_v47, %v179_v46 }
  0x5e   : > { %v182_v49 = vrot.slane %v181_v48, 2 }
  0x60   : > { %v183_v50 = vadd.f32 %v182_v49, %v181_v48 }
  0x62   : > { %v184_v51 = vrot.slane %v183_v50, 1 }
  0x64   : > { %v185_v52 = vadd.f32 %v184_v51, %v183_v50 }
  0x66   : > { %338 = vrsqrt.f32 %v185_v52  ;;  %vm188_vm0 = vcmp.eq.f32.partialorder %v185_v52, inf  ;;  %v191_v54 = vand.u32 2147483648, %v185_v52  ;;  %vm190_vm1 = vcmp.eq.f32.partialorder %v185_v52, 0.0 }
  0x70   : > { %v339_v53 = vpop.eup %338 }
  0x71   : > { %v187_v55 = vmul.f32 %v339_v53, %v185_v52 }
  0x73   : > { %v189_v56 = vsel %vm188_vm0, %v185_v52, %v187_v55 }
  0x74   : > { %v192_v57 = vsel %vm190_vm1, %v191_v54, %v189_v56 }
  0x75   : > { %v194_v58 = vadd.f32 1e-07, %v192_v57  ;;  %vm193_vm2 = vcmp.gt.f32.partialorder %v192_v57, 1e-05 }
  0x77   : > { %340 = vrcp.f32 %v194_v58 }
  0x81   : > { %v341_v59 = vpop.eup %340 }
  0x82   : > { %v196_v60 = vmul.f32 1e-05, %v341_v59 }
  0x84   : > { %v197_v61 = vsel %vm193_vm2, %v196_v60, 1.0 }
  0x85   : > { %v198_v62 = vmul.f32 100000.0, %v197_v61 }
  0x87   : > { %199 = vst [vmem:[%s132_s17] sm:$0x1] %v198_v62 }
  0x88   : > { %385 = shalt.err (!%p382_p3)
}
  0x89   : > { %s386_s14 = scalar_lea.hbm %s594_s3, 16  ;;  %s390_s21 = scalar_lea.hbm %s637_s1, 32 }
  0x8a   : > { %p387_p5 = scmp.ne.s32.totalorder %s594_s3, %s386_s14  ;;  %p391_p9 = scmp.lt.u32.totalorder %s594_s3, %s637_s1 }
  0x8b   : > { %p392_p0 = scmp.lt.u32.totalorder %s390_s21, %s386_s14  ;;  %p394_p6 = scmp.lt.u32.totalorder %s386_s14, %s594_s3 }
  0x8c   : > { %p388_p7 = pnand %p387_p5, %p645_p11 }
  0x8d   : > { %p393_p2 = por %p392_p0, %p391_p9 }
  0x8e   : > { %p389_p8 = pneg %p388_p7 }
  0x8f   : > { %p395_p12 = por %p394_p6, %p393_p2 }
  0x91   : > { %p396_p13 = pnand %p395_p12, %p389_p8 }
  0x93   : > { %399 = shalt.err (!%p396_p13)
}
  0x94   : > { %291 = dma.vmem_to_hbm [thread:$0]  (%p645_p11), %s589_s25, 16, %s594_s3, %s201_s4  }
  0x95 PF: > { %s225_s24 = sand.u32 1, %s426_s6   ;;  %p646_p4 = scmp.ne.s32.totalorder %s642_s19, 0 }
  0x96   : > { %p647_p10 = scmp.ge.s32.totalorder %s438_s9, 2  ;;  %s226_s26 = scalar_lea.sflag [#allocation4], %s225_s24 }
  0x98   : > { %p298_p1 = pnand %p647_p10, %p646_p4 }
  0x9a   : > { %421 = dma.done.wait (!%p298_p1), %s226_s26, 16  }
  0x9b   : > { %423 = vsyncadd (!%p298_p1), %s226_s26, 4294967280  ;;  %p14_p3 = scmp.ge.s32.totalorder %s480_s12, 4   ;;  %s648_s6 = smov %s430_s7 }
  0x9c   : > { %s649_s7 = smov %s434_s8  ;;  %s650_s8 = smov %s492_s15 }
  0x9d   : > { %s651_s9 = smov %s480_s12  ;;  %16 = sbr.rel (!%p14_p3) target bundleno = 5 (0x5), region = 69 }
  0xa4   :  { %230 = vsyncpa [#allocation3], 1 }
  0xa5   :  { %232 = vsyncpa [#allocation3 + $0x1], 1 }
  0xa6   :  { %233 = vsyncpa [#allocation4], 1 }
  0xa7   :  { %235 = vsyncpa [#allocation4 + $0x1], 1 }

</bundles_post_ra>
